<compile_context>
chip_gen: v5e
topology: v5e:2x2
jax: 0.10.0
libtpu: 0.0.40
codegen_flags: <defaults>
</compile_context>

<pallas_src>
import jax
import jax.numpy as jnp
from jax.experimental import pallas as pl
from jax.experimental.pallas import tpu as pltpu


def classifier_kernel(x_ref, w1_ref, b1_ref, w2_ref, b2_ref, w3_ref, b3_ref, o_ref):
    # Fused 3-GEMM MLP on one batch tile. x arrives f32 from HBM and is cast to
    # bf16 here (free VPU filler under the MXU-bound matmuls); biases and
    # accumulation stay f32.
    x = x_ref[...].astype(jnp.bfloat16)                               # [tile, in]

    h1 = jnp.dot(x, w1_ref[...], preferred_element_type=jnp.float32) + b1_ref[...]
    h1 = jnp.maximum(h1, 0.0).astype(jnp.bfloat16)                    # ReLU in f32, cast for MXU
    # TODO(synk): nn.Dropout is identity in eval mode; training-mode dropout would
    # use pltpu.prng_seed / pltpu.prng_random_bits to build a keep mask.

    h2 = jnp.dot(h1, w2_ref[...], preferred_element_type=jnp.float32) + b2_ref[...]
    h2 = jnp.maximum(h2, 0.0).astype(jnp.bfloat16)

    out = jnp.dot(h2, w3_ref[...], preferred_element_type=jnp.float32) + b3_ref[...]
    o_ref[...] = out.astype(o_ref.dtype)


def _const_spec(shape):
    """BlockSpec for a grid-invariant (weight/bias) input: single-buffered if supported."""
    index_map = lambda i: (0,) * len(shape)
    buffered = getattr(pl, "Buffered", None)
    if buffered is not None:
        try:
            return pl.BlockSpec(shape, index_map, pipeline_mode=buffered(1))
        except TypeError:  # older jax: no pipeline_mode kwarg -> default double-buffer
            pass
    return pl.BlockSpec(shape, index_map)


def _pick_batch_tile(B, requested):
    """Sublane-aligned batch tile; >= 2 grid steps when B allows (v7x has 2 TCs)."""
    if B <= 8:
        return B                       # single full block (block == full dim is legal)
    tile = min(requested, B)
    if pl.cdiv(B, tile) < 2:           # give both TensorCores work
        tile = (B + 1) // 2
    tile = max(8, ((tile + 7) // 8) * 8)
    return tile


def prepare_params(params):
    """One-time parameter prep: bf16 weights for the MXU, f32 biases, final
    projection padded to a lane-dense multiple of 128. Call once, reuse across
    forward calls (avoids per-call HBM cast/pad passes)."""
    w1, b1, w2, b2, w3, b3 = (params[k] for k in ("w1", "b1", "w2", "b2", "w3", "b3"))
    num_classes = w3.shape[1]
    c_pad = ((num_classes + 127) // 128) * 128
    if c_pad != num_classes:
        w3 = jnp.pad(w3, ((0, 0), (0, c_pad - num_classes)))
        b3 = jnp.pad(b3, ((0, 0), (0, c_pad - num_classes)))
    return {
        "w1": w1.astype(jnp.bfloat16), "b1": b1.astype(jnp.float32).reshape(1, -1),
        "w2": w2.astype(jnp.bfloat16), "b2": b2.astype(jnp.float32).reshape(1, -1),
        "w3": w3.astype(jnp.bfloat16), "b3": b3.astype(jnp.float32).reshape(1, -1),
        "num_classes": num_classes,
    }


def classifier_forward(x, prepared, *, batch_tile=512, vmem_limit_bytes=48 * 1024 * 1024):
    """x: [B, in_size] float32. prepared: output of prepare_params()."""
    w1, b1, w2, b2, w3, b3 = (prepared[k] for k in ("w1", "b1", "w2", "b2", "w3", "b3"))
    num_classes = prepared["num_classes"]
    B, in_size = x.shape
    h = w1.shape[1]
    h2 = w2.shape[1]
    c_pad = w3.shape[1]

    tile = _pick_batch_tile(B, batch_tile)
    n_tiles = pl.cdiv(B, tile)         # ragged B: Pallas masks the partial last block

    in_specs = [
        pl.BlockSpec((tile, in_size), lambda i: (i, 0)),   # x (pipelined per tile, f32)
        _const_spec((in_size, h)),                          # w1 (resident, 1 buffer)
        _const_spec((1, h)),                                # b1
        _const_spec((h, h2)),                               # w2
        _const_spec((1, h2)),                               # b2
        _const_spec((h2, c_pad)),                           # w3 (lane-dense padded)
        _const_spec((1, c_pad)),                            # b3
    ]
    out_specs = pl.BlockSpec((tile, c_pad), lambda i: (i, 0))

    flops = 2 * n_tiles * tile * (in_size * h + h * h2 + h2 * c_pad)
    bytes_accessed = (
        x.size * x.dtype.itemsize
        + (w1.size + w2.size + w3.size) * 2
        + (b1.size + b2.size + b3.size) * 4
        + B * c_pad * x.dtype.itemsize
    )

    out = pl.pallas_call(
        classifier_kernel,
        out_shape=jax.ShapeDtypeStruct((B, c_pad), x.dtype),
        grid=(n_tiles,),
        in_specs=in_specs,
        out_specs=out_specs,
        compiler_params=pltpu.CompilerParams(
            dimension_semantics=("parallel",),
            vmem_limit_bytes=vmem_limit_bytes,
        ),
        cost_estimate=pl.CostEstimate(
            flops=flops, transcendentals=0, bytes_accessed=bytes_accessed
        ),
    )(x, w1, b1, w2, b2, w3, b3)

    # Only the real classes; padded columns are discarded. No extra dtype pass.
    return out[:, :num_classes]


def init_params(key, in_size, h, num_classes, dtype=jnp.float32):
    """Deterministic init mimicking PyTorch nn.Linear default (uniform +-1/sqrt(fan_in)).
    Weights stored as [in_features, out_features]."""
    ks = jax.random.split(key, 6)

    def linear(kw, kb, fan_in, fan_out):
        bound = 1.0 / jnp.sqrt(fan_in)
        w = jax.random.uniform(kw, (fan_in, fan_out), dtype, -bound, bound)
        b = jax.random.uniform(kb, (1, fan_out), dtype, -bound, bound)
        return w, b

    w1, b1 = linear(ks[0], ks[1], in_size, h)
    w2, b2 = linear(ks[2], ks[3], h, h // 2)
    w3, b3 = linear(ks[4], ks[5], h // 2, num_classes)
    return {"w1": w1, "b1": b1, "w2": w2, "b2": b2, "w3": w3, "b3": b3}


def reference_forward(x, p):
    # Mirrors the kernel numerics: bf16 matmul inputs, f32 accumulation/bias/ReLU.
    # (A pure-f32 PyTorch Classifier would differ by ~bf16 rounding of the GEMM inputs.)
    xb = x.astype(jnp.bfloat16)
    w1 = p["w1"].astype(jnp.bfloat16)
    w2 = p["w2"].astype(jnp.bfloat16)
    w3 = p["w3"].astype(jnp.bfloat16)
    h1 = jnp.maximum(
        jnp.dot(xb, w1, preferred_element_type=jnp.float32) + p["b1"], 0.0
    ).astype(jnp.bfloat16)
    h2 = jnp.maximum(
        jnp.dot(h1, w2, preferred_element_type=jnp.float32) + p["b2"], 0.0
    ).astype(jnp.bfloat16)
    return jnp.dot(h2, w3, preferred_element_type=jnp.float32) + p["b3"]


if __name__ == "__main__":
    # Small shapes consistent with the module (real: in_size=2048, h=1024).
    # B=200 is deliberately ragged to exercise the masked partial last block and
    # the 2-step grid split; num_classes=10 exercises the lane-dense C padding.
    B, in_size, h, num_classes = 200, 256, 128, 10

    key = jax.random.PRNGKey(0)
    k_x, k_p = jax.random.split(key)
    x = jax.random.normal(k_x, (B, in_size), jnp.float32)
    params = init_params(k_p, in_size, h, num_classes)
    prepared = prepare_params(params)   # one-time cast/pad, reused across calls

    out = classifier_forward(x, prepared)
    out = jax.block_until_ready(out)

    ref = reference_forward(x, params)
    assert out.shape == (B, num_classes)
    assert jnp.allclose(out, ref, atol=5e-3, rtol=5e-3), float(jnp.max(jnp.abs(out - ref)))

    print("KERNEL_OK")
</pallas_src>

<mosaic_0001>
module attributes {stable_mosaic.version = 11 : i64} {
  func.func @classifier_kernel(%arg0: i32, %arg1: memref<104x256xf32, #tpu.memory_space<vmem>>, %arg2: memref<256x128xbf16, #tpu.memory_space<vmem>>, %arg3: memref<1x128xf32, #tpu.memory_space<vmem>>, %arg4: memref<128x64xbf16, #tpu.memory_space<vmem>>, %arg5: memref<1x64xf32, #tpu.memory_space<vmem>>, %arg6: memref<64x128xbf16, #tpu.memory_space<vmem>>, %arg7: memref<1x128xf32, #tpu.memory_space<vmem>>, %arg8: memref<104x128xf32, #tpu.memory_space<vmem>>) attributes {dimension_semantics = [#tpu.dimension_semantics<parallel>], iteration_bounds = array<i64: 2>, scalar_prefetch = 0 : i64, scratch_operands = 0 : i64, tpu.core_type = #tpu.core_type<tc>, window_params = [{transform_indices = @transform_0, window_bounds = array<i64: 104, 256>}, {pipeline_mode = #tpu.pipeline_mode<synchronous>, transform_indices = @transform_1, window_bounds = array<i64: 256, 128>}, {pipeline_mode = #tpu.pipeline_mode<synchronous>, transform_indices = @transform_2, window_bounds = array<i64: 1, 128>}, {pipeline_mode = #tpu.pipeline_mode<synchronous>, transform_indices = @transform_3, window_bounds = array<i64: 128, 64>}, {pipeline_mode = #tpu.pipeline_mode<synchronous>, transform_indices = @transform_4, window_bounds = array<i64: 1, 64>}, {pipeline_mode = #tpu.pipeline_mode<synchronous>, transform_indices = @transform_5, window_bounds = array<i64: 64, 128>}, {pipeline_mode = #tpu.pipeline_mode<synchronous>, transform_indices = @transform_6, window_bounds = array<i64: 1, 128>}, {transform_indices = @transform_7, window_bounds = array<i64: 104, 128>}]} {
    %c0 = arith.constant 0 : index
    %c0_0 = arith.constant 0 : index
    %0 = vector.load %arg1[%c0, %c0_0] : memref<104x256xf32, #tpu.memory_space<vmem>>, vector<104x256xf32>
    %1 = arith.truncf %0 : vector<104x256xf32> to vector<104x256xbf16>
    %c0_1 = arith.constant 0 : index
    %c0_2 = arith.constant 0 : index
    %2 = vector.load %arg2[%c0_1, %c0_2] : memref<256x128xbf16, #tpu.memory_space<vmem>>, vector<256x128xbf16>
    %cst = arith.constant dense<0.000000e+00> : vector<104x128xf32>
    %3 = tpu.matmul %1, %2, %cst {dimension_numbers = #tpu.dot_dimension_numbers<[1], [0], [0], [1], [0, 0, 1, 1], [], []>} : vector<104x256xbf16>, vector<256x128xbf16>, vector<104x128xf32> -> vector<104x128xf32>
    %c0_3 = arith.constant 0 : index
    %c0_4 = arith.constant 0 : index
    %4 = vector.load %arg3[%c0_3, %c0_4] : memref<1x128xf32, #tpu.memory_space<vmem>>, vector<1x128xf32>
    %5 = vector.broadcast %4 : vector<1x128xf32> to vector<104x128xf32>
    %6 = arith.addf %3, %5 : vector<104x128xf32>
    %cst_5 = arith.constant 0.000000e+00 : f32
    %7 = vector.broadcast %cst_5 : f32 to vector<104x128xf32>
    %8 = arith.maximumf %6, %7 : vector<104x128xf32>
    %9 = arith.truncf %8 : vector<104x128xf32> to vector<104x128xbf16>
    %c0_6 = arith.constant 0 : index
    %c0_7 = arith.constant 0 : index
    %10 = vector.load %arg4[%c0_6, %c0_7] : memref<128x64xbf16, #tpu.memory_space<vmem>>, vector<128x64xbf16>
    %cst_8 = arith.constant dense<0.000000e+00> : vector<104x64xf32>
    %11 = tpu.matmul %9, %10, %cst_8 {dimension_numbers = #tpu.dot_dimension_numbers<[1], [0], [0], [1], [0, 0, 1, 1], [], []>} : vector<104x128xbf16>, vector<128x64xbf16>, vector<104x64xf32> -> vector<104x64xf32>
    %c0_9 = arith.constant 0 : index
    %c0_10 = arith.constant 0 : index
    %12 = vector.load %arg5[%c0_9, %c0_10] : memref<1x64xf32, #tpu.memory_space<vmem>>, vector<1x64xf32>
    %13 = vector.broadcast %12 : vector<1x64xf32> to vector<104x64xf32>
    %14 = arith.addf %11, %13 : vector<104x64xf32>
    %cst_11 = arith.constant 0.000000e+00 : f32
    %15 = vector.broadcast %cst_11 : f32 to vector<104x64xf32>
    %16 = arith.maximumf %14, %15 : vector<104x64xf32>
    %17 = arith.truncf %16 : vector<104x64xf32> to vector<104x64xbf16>
    %c0_12 = arith.constant 0 : index
    %c0_13 = arith.constant 0 : index
    %18 = vector.load %arg6[%c0_12, %c0_13] : memref<64x128xbf16, #tpu.memory_space<vmem>>, vector<64x128xbf16>
    %cst_14 = arith.constant dense<0.000000e+00> : vector<104x128xf32>
    %19 = tpu.matmul %17, %18, %cst_14 {dimension_numbers = #tpu.dot_dimension_numbers<[1], [0], [0], [1], [0, 0, 1, 1], [], []>} : vector<104x64xbf16>, vector<64x128xbf16>, vector<104x128xf32> -> vector<104x128xf32>
    %c0_15 = arith.constant 0 : index
    %c0_16 = arith.constant 0 : index
    %20 = vector.load %arg7[%c0_15, %c0_16] : memref<1x128xf32, #tpu.memory_space<vmem>>, vector<1x128xf32>
    %21 = vector.broadcast %20 : vector<1x128xf32> to vector<104x128xf32>
    %22 = arith.addf %19, %21 : vector<104x128xf32>
    %c0_17 = arith.constant 0 : index
    %c0_18 = arith.constant 0 : index
    %23 = vector.load %arg8[%c0_17, %c0_18] : memref<104x128xf32, #tpu.memory_space<vmem>>, vector<104x128xf32>
    tpu.vector_store %arg8[%c0_17, %c0_18], %22 {strides = array<i32>} : memref<104x128xf32, #tpu.memory_space<vmem>>, vector<104x128xf32>,
    return
  }
  func.func @transform_0(%arg0: i32) -> (i32, i32) {
    %c0_i32 = arith.constant 0 : i32
    %c0_i32_0 = arith.constant 0 : i32
    return %arg0, %c0_i32 : i32, i32
  }
  func.func @transform_1(%arg0: i32) -> (i32, i32) {
    %c0_i32 = arith.constant 0 : i32
    %c0_i32_0 = arith.constant 0 : i32
    %c0_i32_1 = arith.constant 0 : i32
    return %c0_i32, %c0_i32_0 : i32, i32
  }
  func.func @transform_2(%arg0: i32) -> (i32, i32) {
    %c0_i32 = arith.constant 0 : i32
    %c0_i32_0 = arith.constant 0 : i32
    %c0_i32_1 = arith.constant 0 : i32
    return %c0_i32, %c0_i32_0 : i32, i32
  }
  func.func @transform_3(%arg0: i32) -> (i32, i32) {
    %c0_i32 = arith.constant 0 : i32
    %c0_i32_0 = arith.constant 0 : i32
    %c0_i32_1 = arith.constant 0 : i32
    return %c0_i32, %c0_i32_0 : i32, i32
  }
  func.func @transform_4(%arg0: i32) -> (i32, i32) {
    %c0_i32 = arith.constant 0 : i32
    %c0_i32_0 = arith.constant 0 : i32
    %c0_i32_1 = arith.constant 0 : i32
    return %c0_i32, %c0_i32_0 : i32, i32
  }
  func.func @transform_5(%arg0: i32) -> (i32, i32) {
    %c0_i32 = arith.constant 0 : i32
    %c0_i32_0 = arith.constant 0 : i32
    %c0_i32_1 = arith.constant 0 : i32
    return %c0_i32, %c0_i32_0 : i32, i32
  }
  func.func @transform_6(%arg0: i32) -> (i32, i32) {
    %c0_i32 = arith.constant 0 : i32
    %c0_i32_0 = arith.constant 0 : i32
    %c0_i32_1 = arith.constant 0 : i32
    return %c0_i32, %c0_i32_0 : i32, i32
  }
  func.func @transform_7(%arg0: i32) -> (i32, i32) {
    %c0_i32 = arith.constant 0 : i32
    %c0_i32_0 = arith.constant 0 : i32
    return %arg0, %c0_i32 : i32, i32
  }
}

</mosaic_0001>

<bundles_post_ra>
// kernel: tpu_custom_call.1
= control target key start
LH: loop header
LB: loop body
LE: loop exit
PB: predicated region body
PF: predicated region fallthrough
CT: control target
= control target key end

     0   :  { %s1711_s0 = inlined_call_operand.hbm [shape: f32[200,256], index: 0, kind: input, shape index: {}]   ;;  %s1712_s1 = inlined_call_operand.hbm [shape: bf16[256,128], index: 1, kind: input, shape index: {}]   ;;  %s1713_s2 = inlined_call_operand.vmem [shape: f32[1,128], index: 2, kind: input, shape index: {}]   ;;  %s1714_s3 = inlined_call_operand.vmem [shape: bf16[128,64], index: 3, kind: input, shape index: {}]   ;;  %s1715_s4 = inlined_call_operand.vmem [shape: f32[1,64], index: 4, kind: input, shape index: {}]   ;;  %s1716_s5 = inlined_call_operand.vmem [shape: bf16[64,128], index: 5, kind: input, shape index: {}]   ;;  %s1717_s6 = inlined_call_operand.vmem [shape: f32[1,128], index: 6, kind: input, shape index: {}]   ;;  %s1718_s7 = inlined_call_operand.hbm [shape: f32[200,128], index: 7, kind: output, shape index: {}]  }
   0x1   :  { %1724 = sst [smem:[#allocation14_spill]] %s1712_s1 }
   0x2   :  { %12 = vsyncpa [#allocation3], 0 }
   0x3   :  { %14 = vsyncpa [#allocation3 + $0x1], 0 }
   0x4   :  { %15 = vsyncpa [#allocation6], 0 }
   0x5   :  { %16 = vsyncpa [#allocation4], 0 }
   0x6   :  { %18 = vsyncpa [#allocation4 + $0x1], 0  ;;  %s1401_s24 = smov 0   ;;  %s1403_s25 = smov 0  }
   0x7   :  { %s1405_s26 = smov 0   ;;  %s1407_s27 = smov 0  }
   0x8 LB: > { %1725 = sst [smem:[#allocation11_spill]] %s1346_s26  ;;  %s1422_s28 = sadd.s32 4294967295, %s1350_s27   ;;  %s1350_s27 = sphi %s1407_s27, %s1740_s27   ;;  %s1346_s26 = sphi %s1405_s26, %s1742_s26   ;;  %s1342_s25 = sphi %s1403_s25, %s1744_s25   ;;  %s1338_s24 = sphi %s1401_s24, %s1743_s24  }
   0x9   : > { %s966_s29 = sadd.s32 4294967294, %s1350_s27   ;;  %s1426_s30 = sadd.s32 1, %s1350_s27  }
   0xa   : > { %1726 = sst [smem:[#allocation12_spill]] %s1426_s30  ;;  %s31_s8 = sadd.s32 1, %s1346_s26 }
   0xb   : > { %s28_s9 = ssub.s32 %s1350_s27, %s1426_s30  ;;  %p38_p0 = scmp.ne.s32.totalorder %s1346_s26, %s1342_s25 }
   0xc   : > { %p29_p1 = scmp.eq.s32.totalorder %s28_s9, 0  ;;  %p39_p2 = scmp.eq.s32.totalorder %s1350_s27, 0 }
   0xd   : > { %p44_p3 = scmp.ne.s32.totalorder %s1342_s25, %s1338_s24  ;;  %p1723_p4 = scmp.eq.s32.totalorder %s1422_s28, 0 }
   0xe   : > { %s1438_s10 = scalar_select %p29_p1, %s1346_s26, %s31_s8  }
   0xf   : > { %p1440_p5 = por %p39_p2, %p38_p0  ;;  %p1446_p6 = por %p1723_p4, %p44_p3 }
  0x10   : > { %1727 = sst [smem:[#allocation13_spill]] %s1438_s10  ;;  %p194_p7 = scmp.eq.s32.totalorder %s1422_s28, 1 }
  0x11   : > { %p200_p8 = scmp.eq.s32.totalorder %s966_s29, 1  ;;  %p967_p9 = scmp.ge.s32.totalorder %s1350_s27, 1 }
  0x12   : > { %p207_p10 = scmp.lt.s32.totalorder %s1350_s27, 3  ;;  %p1453_p11 = por %p194_p7, %p38_p0 }
  0x13   : > { %p1457_p12 = por %p200_p8, %p44_p3  ;;  %s1733_s1 = sld [smem:[#allocation14_spill]] }
  0x14   : > { %p1461_p13 = pnand %p967_p9, %p207_p10  ;;  %s1352_s19 = smov [#allocation5]  }
  0x15   : > { %s1731_s14 = scalar_select %p1457_p12, 1, 0 }
  0x16   : > { %p1147_p1 = pneg %p1461_p13  ;;  %s220_s20 = sshll.u32 %s1352_s19, 4  ;;  %s221_s20 = int_to_ptr.vmem [resolvable:$true] %s220_s20 }
  0x17   : > { %s1353_s21 = smov 64   ;;  %s1354_s22 = smov 4  }
  0x18   : > { %p1148_p0 = pnand %p1147_p1, %p1723_p4  ;;  %p1722_p2 = scmp.ge.s32.totalorder %s1350_s27, 2 }
  0x19   : > { %s218_s18 = sshll.u32 %s1733_s1, 4  ;;  %s219_s18 = int_to_ptr.hbm [resolvable:$true] %s218_s18 }
  0x1a   : > { %1150 = dma.hbm_to_vmem [thread:$0]  (!%p1148_p0), %s219_s18, 2048, %s221_s20, [#allocation6], %s1353_s21, %s1353_s21, %s1354_s22  }
  0x1b   : > { %245 = sbr.rel (%p1722_p2) target bundleno = 70 (0x46), region = 40 }
  0x20   : > { %248 = sbr.rel (!%p1440_p5) target bundleno = 70 (0x46), region = 44  ;;  %s249_s23 = sand.u32 (%p1440_p5), 1, %s1346_s26  }
  0x21   : > { %s254_s29 = smul.u32 (%p1440_p5), 13, %s1350_s27  ;;  %s1482_s19 = scalar_lea.sflag (%p1440_p5), [#allocation3], %s249_s23 }
  0x22   : > { %s1138_s8 = smul.u32 (%p1440_p5), 208, %s249_s23 }
  0x23   : > { %s255_s9 = ssub.s32 (%p1440_p5), 25, %s254_s29 }
  0x24   : > { %p256_p3 = scmp.lt.s32.totalorder (%p1440_p5), %s255_s9, 13  ;;  %s253_s20 = scalar_lea.vmem (%p1440_p5), [#allocation2], %s1138_s8 }
  0x26   : > { %s1746_s9 = smov (!%p256_p3, %s255_s9), 13 }
  0x27   : > { %s1105_s16 = sshll.u32 %s1746_s9, 4 }
  0x28   : > { %s260_s17 = ssub.s32 208, %s1105_s16 }
  0x29   : > { %s261_s18 = sshll.u32 %s260_s17, 4 }
  0x2a   : > { %262 = vsyncadd %s1482_s19, %s261_s18  ;;  %p1485_p5 = scmp.ne.s32.totalorder %s1105_s16, 0  ;;  %s1137_s21 = smul.u32 208, %s1350_s27 }
  0x2b   : > { %s1490_s22 = sshll.u32 %s253_s20, 4  ;;  %s976_s29 = sshll.u32 %s1746_s9, 8  ;;  %s271_s22 = int_to_ptr.vmem [resolvable:$true] %s1490_s22 }
  0x2c   : > { %s266_s23 = scalar_lea.hbm %s1711_s0, %s1137_s21  ;;  %s1232_s16 = sshrl.u32 %s976_s29, 4 }
  0x2d   : > { %s268_s8 = sshll.u32 %s266_s23, 4  ;;  %s1241_s30 = scalar_lea.hbm %s1711_s0, 400  ;;  %s1497_s8 = int_to_ptr.hbm [resolvable:$true] %s268_s8 }
  0x2e   : > { %s1230_s18 = sshra.s32 %s1497_s8, 4  ;;  %s1231_s18 = int_to_ptr.hbm [resolvable:$true] %s1230_s18 }
  0x2f   : > { %s1237_s10 = scalar_lea.hbm %s1231_s18, %s1232_s16  ;;  %p1242_p10 = scmp.lt.s32.totalorder %s1231_s18, %s1711_s0 }
  0x30   : > { %p1238_p7 = scmp.ne.s32.totalorder %s1231_s18, %s1237_s10  ;;  %p1243_p1 = scmp.lt.s32.totalorder %s1241_s30, %s1237_s10 }
  0x32   : > { %p1239_p8 = pnand %p1238_p7, %p1485_p5  ;;  %p1244_p0 = por %p1243_p1, %p1242_p10 }
  0x34   : > { %p1240_p9 = pneg %p1239_p8 }
  0x36   : > { %p1245_p3 = pnand %p1244_p0, %p1240_p9 }
  0x38   : > { %1248 = shalt.err (!%p1245_p3)
}
  0x39   : > { %s1249_s17 = sshra.s32 %s271_s22, 4  ;;  %s1355_s26 = smov [#allocation2]   ;;  %s1250_s17 = int_to_ptr.vmem [resolvable:$true] %s1249_s17 }
  0x3a   : > { %s1256_s23 = scalar_lea.vmem %s1250_s17, %s1232_s16  ;;  %s1260_s20 = scalar_lea.vmem %s1355_s26, 416 }
  0x3b   : > { %p1257_p7 = scmp.ne.s32.totalorder %s1250_s17, %s1256_s23  ;;  %p1262_p4 = scmp.lt.s32.totalorder %s1260_s20, %s1256_s23 }
  0x3d   : > { %p1258_p8 = pnand %p1257_p7, %p1485_p5 }
  0x3f   : > { %p1259_p2 = pneg %p1258_p8 }
  0x41   : > { %p1264_p12 = pnand %p1262_p4, %p1259_p2 }
  0x43   : > { %1267 = shalt.err (!%p1264_p12)
}
  0x44   : > { %s1356_s18 = smov 256   ;;  %s1357_s30 = smov 16  }
  0x45   : > { %276 = dma.hbm_to_vmem [thread:$0]  (%p1485_p5), %s1497_s8, %s976_s29, %s271_s22, %s1482_s19, %s1356_s18, %s1356_s18, %s1357_s30  }
  0x46 PF: > { %282 = sbr.rel (%p1461_p13) target bundleno = 666 (0x29a), region = 48  ;;  %s1525_s10 = sand.u32 (!%p1461_p13), 1, %s1342_s25  }
  0x47   : > { %s1139_s16 = smul.u32 (!%p1461_p13), 208, %s1525_s10  ;;  %s285_s1 = scalar_lea.sflag (!%p1461_p13), [#allocation3], %s1525_s10 }
  0x49   : > { %s1529_s21 = scalar_lea.vmem (!%p1461_p13), [#allocation2], %s1139_s16 }
  0x4b   : > { %1325 = dma.done.wait (%p1446_p6), %s285_s1, 3328  }
  0x4c   : > { %1327 = vsyncadd (%p1446_p6), %s285_s1, 4294963968  ;;  %p1735_p4 = scmp.eq.s32.totalorder %s1422_s28, 0 }
  0x4e   : > { %1329 = dma.done.wait (%p1735_p4), [#allocation6], 2048   ;;  %p1736_p12 = pmov %p1735_p4 }
  0x4f   : > { %v1115_v0 = vld [vmem:[#allocation5 + $0x38] sm:$0xff]  ;;  %v1114_v2 = vld [vmem:[#allocation5 + $0x30] sm:$0xff]  ;;  %v1113_v4 = vld [vmem:[#allocation5 + $0x28] sm:$0xff]  ;;  %vm782_vm0 = vcmask 523264   ;;  %s1140_s20 = smul.u32 104, %s1525_s10  ;;  %s861_s1 = scalar_lea.sflag [#allocation4], %s1525_s10 }
  0x50   : > { %1331 = vsyncadd (%p1736_p12), [#allocation6], 4294965248  ;;  %v1123_v1 = vld [vmem:[#allocation5 + $0x78] sm:$0xff]  ;;  %509 = vmatpush.bf16.msra.mxu0 %v1115_v0  ;;  %v1122_v3 = vld [vmem:[#allocation5 + $0x70] sm:$0xff] }
  0x51   : > { %552 = vmatpush.bf16.msra.mxu1 %v1123_v1  ;;  %v1121_v5 = vld [vmem:[#allocation5 + $0x68] sm:$0xff]  ;;  %v1112_v6 = vld [vmem:[#allocation5 + $0x20] sm:$0xff]  ;;  %v1111_v8 = vld [vmem:[#allocation5 + $0x18] sm:$0xff]  ;;  %s1633_s16 = scalar_lea.vmem [#allocation7], %s1140_s20 }
  0x52   : > { %v1120_v7 = vld [vmem:[#allocation5 + $0x60] sm:$0xff]  ;;  %v1119_v9 = vld [vmem:[#allocation5 + $0x58] sm:$0xff]  ;;  %v1110_v10 = vld [vmem:[#allocation5 + $0x10] sm:$0xff] }
  0x53   : > { %v1118_v11 = vld [vmem:[#allocation5 + $0x50] sm:$0xff]  ;;  %v1109_v12 = vld [vmem:[#allocation5 + $0x8] sm:$0xff]  ;;  %v1108_v14 = vld [vmem:[#allocation5] sm:$0xff] }
  0x54   : > { %510 = vmatpush.bf16.msra.mxu0 %v1114_v2  ;;  %v1117_v13 = vld [vmem:[#allocation5 + $0x48] sm:$0xff]  ;;  %v1116_v15 = vld [vmem:[#allocation5 + $0x40] sm:$0xff]  ;;  %v1131_v46 = vld [vmem:[%s1714_s3 + $0x38] sm:$0xff] }
  0x55   : > { %553 = vmatpush.bf16.msra.mxu1 %v1122_v3  ;;  %v337_v16 = vld [vmem:[%s1529_s21] sm:$0xff]  ;;  %v339_v17 = vld [vmem:[%s1529_s21 + $0x10] sm:$0xff]  ;;  %v338_v18 = vld [vmem:[%s1529_s21 + $0x8] sm:$0xff]  ;;  %683 = vmatpush.bf16.msra.mxu2 %v1131_v46 }
  0x56   : > { %v340_v19 = vld [vmem:[%s1529_s21 + $0x18] sm:$0xff]  ;;  %v363_v20 = vpack.c.bf16 %v339_v17, %v337_v16  ;;  %v341_v22 = vld [vmem:[%s1529_s21 + $0x20] sm:$0xff]  ;;  %v343_v23 = vld [vmem:[%s1529_s21 + $0x30] sm:$0xff] }
  0x57   : > { %v364_v21 = vpack.c.bf16 %v340_v19, %v338_v18  ;;  %v342_v24 = vld [vmem:[%s1529_s21 + $0x28] sm:$0xff]  ;;  %v344_v25 = vld [vmem:[%s1529_s21 + $0x38] sm:$0xff]  ;;  %v365_v26 = vpack.c.bf16 %v343_v23, %v341_v22  ;;  %v345_v28 = vld [vmem:[%s1529_s21 + $0x40] sm:$0xff] }
  0x58   : > { %511 = vmatpush.bf16.msra.mxu0 %v1113_v4  ;;  %v366_v27 = vpack.c.bf16 %v344_v25, %v342_v24  ;;  %v347_v29 = vld [vmem:[%s1529_s21 + $0x50] sm:$0xff]  ;;  %v346_v30 = vld [vmem:[%s1529_s21 + $0x48] sm:$0xff]  ;;  %v348_v31 = vld [vmem:[%s1529_s21 + $0x58] sm:$0xff] }
  0x59   : > { %554 = vmatpush.bf16.msra.mxu1 %v1121_v5  ;;  %v367_v32 = vpack.c.bf16 %v347_v29, %v345_v28  ;;  %v368_v33 = vpack.c.bf16 %v348_v31, %v346_v30  ;;  %v349_v34 = vld [vmem:[%s1529_s21 + $0x60] sm:$0xff]  ;;  %v351_v35 = vld [vmem:[%s1529_s21 + $0x70] sm:$0xff]  ;;  %v350_v36 = vld [vmem:[%s1529_s21 + $0x68] sm:$0xff] }
  0x5a   : > { %v352_v37 = vld [vmem:[%s1529_s21 + $0x78] sm:$0xff]  ;;  %v369_v38 = vpack.c.bf16 %v351_v35, %v349_v34  ;;  %v353_v40 = vld [vmem:[%s1529_s21 + $0x80] sm:$0xff]  ;;  %v355_v41 = vld [vmem:[%s1529_s21 + $0x90] sm:$0xff] }
  0x5b   : > { %v370_v39 = vpack.c.bf16 %v352_v37, %v350_v36  ;;  %v354_v42 = vld [vmem:[%s1529_s21 + $0x88] sm:$0xff]  ;;  %v356_v43 = vld [vmem:[%s1529_s21 + $0x98] sm:$0xff]  ;;  %v371_v44 = vpack.c.bf16 %v355_v41, %v353_v40  ;;  %v1130_v47 = vld [vmem:[%s1714_s3 + $0x30] sm:$0xff] }
  0x5c   : > { %512 = vmatpush.bf16.msra.mxu0 %v1112_v6  ;;  %v372_v45 = vpack.c.bf16 %v356_v43, %v354_v42  ;;  %684 = vmatpush.bf16.msra.mxu2 %v1130_v47  ;;  %v1129_v48 = vld [vmem:[%s1714_s3 + $0x28] sm:$0xff]  ;;  %v357_v49 = vld [vmem:[%s1529_s21 + $0xa0] sm:$0xff]  ;;  %v359_v50 = vld [vmem:[%s1529_s21 + $0xb0] sm:$0xff] }
  0x5d   : > { %555 = vmatpush.bf16.msra.mxu1 %v1120_v7  ;;  %v358_v51 = vld [vmem:[%s1529_s21 + $0xa8] sm:$0xff]  ;;  %v360_v52 = vld [vmem:[%s1529_s21 + $0xb8] sm:$0xff]  ;;  %v1128_v53 = vld [vmem:[%s1714_s3 + $0x20] sm:$0xff]  ;;  %v373_v54 = vpack.c.bf16 %v359_v50, %v357_v49 }
  0x5e   : > { %v374_v55 = vpack.c.bf16 %v360_v52, %v358_v51  ;;  %v361_v56 = vld [vmem:[%s1529_s21 + $0xc0] sm:$0xff]  ;;  %v362_v57 = vld [vmem:[%s1529_s21 + $0xc8] sm:$0xff]  ;;  %s868_s21 = smul.u32 (%p1453_p11), 13, %s1422_s28 }
  0x5f   : > { %v375_v58 = vpack.c.bf16 %v361_v56, %v361_v56  ;;  %v376_v59 = vpack.c.bf16 %v362_v57, %v362_v57  ;;  %v1127_v60 = vld [vmem:[%s1714_s3 + $0x18] sm:$0xff]  ;;  %v1126_v61 = vld [vmem:[%s1714_s3 + $0x10] sm:$0xff]  ;;  %v1125_v62 = vld [vmem:[%s1714_s3 + $0x8] sm:$0xff] }
  0x60   : > { %513 = vmatpush.bf16.msra.mxu0 %v1111_v8  ;;  %685 = vmatpush.bf16.msra.mxu2 %v1129_v48  ;;  %v1124_v63 = vld [vmem:[%s1714_s3] sm:$0xff]  ;;  %s869_s12 = ssub.s32 (%p1453_p11), 25, %s868_s21 }
  0x61   : > { %556 = vmatpush.bf16.msra.mxu1 %v1119_v9  ;;  %v1592_v2 = vld [vmem:[%s1713_s2] ss:$0 sm:$0xff]  ;;  %p870_p6 = scmp.lt.s32.totalorder (%p1453_p11), %s869_s12, 13 }
  0x64   : > { %514 = vmatpush.bf16.msra.mxu0 %v1110_v10  ;;  %686 = vmatpush.bf16.msra.mxu2 %v1128_v53 }
  0x65   : > { %557 = vmatpush.bf16.msra.mxu1 %v1118_v11 }
  0x68   : > { %515 = vmatpush.bf16.msra.mxu0 %v1109_v12  ;;  %687 = vmatpush.bf16.msra.mxu2 %v1127_v60 }
  0x69   : > { %558 = vmatpush.bf16.msra.mxu1 %v1117_v13 }
  0x6c   : > { %516 = vmatpush.bf16.msra.mxu0 %v1108_v14  ;;  %688 = vmatpush.bf16.msra.mxu2 %v1126_v61 }
  0x6d   : > { %559 = vmatpush.bf16.msra.mxu1 %v1116_v15 }
  0x6f   : > { %517 = vmatmul.bf16.vlgmr.msra.gmra.mxu0 %v363_v20 }
  0x70   : > { %560 = vmatmul.bf16.vlgmr.msra.gmra.mxu1 %v364_v21  ;;  %689 = vmatpush.bf16.msra.mxu2 %v1125_v62 }
  0x74   : > { %690 = vmatpush.bf16.msra.mxu2 %v1124_v63 }
  0x7f   : > { %522 = vmatmul.bf16.gmra.mxu0 %v365_v26 }
  0x80   : > { %565 = vmatmul.bf16.gmra.mxu1 %v366_v27 }
  0x8f   : > { %527 = vmatmul.bf16.gmra.mxu0 %v367_v32 }
  0x90   : > { %570 = vmatmul.bf16.gmra.mxu1 %v368_v33 }
  0x9f   : > { %532 = vmatmul.bf16.gmra.mxu0 %v369_v38 }
  0xa0   : > { %575 = vmatmul.bf16.gmra.mxu1 %v370_v39 }
  0xaf   : > { %537 = vmatmul.bf16.gmra.mxu0 %v371_v44 }
  0xb0   : > { %580 = vmatmul.bf16.gmra.mxu1 %v372_v45 }
  0xbf   : > { %542 = vmatmul.bf16.gmra.mxu0 %v373_v54 }
  0xc0   : > { %585 = vmatmul.bf16.gmra.mxu1 %v374_v55 }
  0xcf   : > { %547 = vmatmul.bf16.gmra.mxu0 %v375_v58 }
  0xd0   : > { %590 = vmatmul.bf16.gmra.mxu1 %v376_v59 }
  0xec   : > { %v518_v0 = vpop.f32.mrf.mxu0 }
  0xed   : > { %v561_v1 = vpop.f32.mrf.mxu1  ;;  %v519_v3 = vadd.f32 %v1592_v2, %v518_v0 }
  0xef   : > { %v562_v6 = vadd.f32 %v561_v1, %v519_v3 }
  0xf1   : > { %v595_v9 = vmax.f32 %v562_v6, 0.0 }
  0xf4   : > { %v520_v4 = vpop.f32.mrf.mxu0 }
  0xf5   : > { %v563_v5 = vpop.f32.mrf.mxu1  ;;  %v521_v7 = vadd.f32 %v1592_v2, %v520_v4 }
  0xf7   : > { %v564_v8 = vadd.f32 %v563_v5, %v521_v7 }
  0xf9   : > { %v596_v10 = vmax.f32 %v564_v8, 0.0 }
  0xfb   : > { %v608_v11 = vpack.c.bf16 %v596_v10, %v595_v9 }
  0xfc   : > { %v523_v12 = vpop.f32.mrf.mxu0 }
  0xfd   : > { %v566_v13 = vpop.f32.mrf.mxu1  ;;  %691 = vmatmul.bf16.vlgmr.msra.gmra.mxu2 %v608_v11  ;;  %v524_v14 = vadd.f32 %v1592_v2, %v523_v12  ;;  %v1135_v12 = vld [vmem:[%s1716_s5 + $0x18] sm:$0xff] }
  0xfe   : > { %808 = vmatpush.bf16.msra.mxu3 %v1135_v12 }
  0xff   : > { %v567_v17 = vadd.f32 %v566_v13, %v524_v14  ;;  %v1134_v13 = vld [vmem:[%s1716_s5 + $0x10] sm:$0xff]  ;;  %v1132_v14 = vld [vmem:[%s1716_s5] sm:$0xff] }
 0x101   : > { %v597_v20 = vmax.f32 %v567_v17, 0.0 }
 0x102   : > { %809 = vmatpush.bf16.msra.mxu3 %v1134_v13 }
 0x104   : > { %v525_v15 = vpop.f32.mrf.mxu0 }
 0x105   : > { %v568_v16 = vpop.f32.mrf.mxu1  ;;  %v526_v18 = vadd.f32 %v1592_v2, %v525_v15 }
 0x107   : > { %v569_v19 = vadd.f32 %v568_v16, %v526_v18  ;;  %v1198_v16 = vld [vmem:[%s1715_s4] ss:$0 sm:$0xff] }
 0x109   : > { %v598_v21 = vmax.f32 %v569_v19, 0.0 }
 0x10b   : > { %v609_v22 = vpack.c.bf16 %v598_v21, %v597_v20 }
 0x10c   : > { %v528_v23 = vpop.f32.mrf.mxu0 }
 0x10d   : > { %v571_v24 = vpop.f32.mrf.mxu1  ;;  %696 = vmatmul.bf16.gmra.mxu2 %v609_v22  ;;  %v529_v25 = vadd.f32 %v1592_v2, %v528_v23 }
 0x10f   : > { %v572_v28 = vadd.f32 %v571_v24, %v529_v25 }
 0x111   : > { %v599_v31 = vmax.f32 %v572_v28, 0.0 }
 0x114   : > { %v530_v26 = vpop.f32.mrf.mxu0 }
 0x115   : > { %v573_v27 = vpop.f32.mrf.mxu1  ;;  %v531_v29 = vadd.f32 %v1592_v2, %v530_v26 }
 0x117   : > { %v574_v30 = vadd.f32 %v573_v27, %v531_v29 }
 0x119   : > { %v600_v32 = vmax.f32 %v574_v30, 0.0 }
 0x11b   : > { %v610_v33 = vpack.c.bf16 %v600_v32, %v599_v31 }
 0x11c   : > { %v533_v34 = vpop.f32.mrf.mxu0 }
 0x11d   : > { %v576_v35 = vpop.f32.mrf.mxu1  ;;  %701 = vmatmul.bf16.gmra.mxu2 %v610_v33  ;;  %v534_v36 = vadd.f32 %v1592_v2, %v533_v34 }
 0x11f   : > { %v577_v39 = vadd.f32 %v576_v35, %v534_v36 }
 0x121   : > { %v601_v42 = vmax.f32 %v577_v39, 0.0 }
 0x124   : > { %v535_v37 = vpop.f32.mrf.mxu0 }
 0x125   : > { %v578_v38 = vpop.f32.mrf.mxu1  ;;  %v536_v40 = vadd.f32 %v1592_v2, %v535_v37 }
 0x127   : > { %v579_v41 = vadd.f32 %v578_v38, %v536_v40 }
 0x129   : > { %v602_v43 = vmax.f32 %v579_v41, 0.0 }
 0x12b   : > { %v611_v44 = vpack.c.bf16 %v602_v43, %v601_v42 }
 0x12c   : > { %v538_v45 = vpop.f32.mrf.mxu0 }
 0x12d   : > { %v581_v46 = vpop.f32.mrf.mxu1  ;;  %706 = vmatmul.bf16.gmra.mxu2 %v611_v44  ;;  %v539_v47 = vadd.f32 %v1592_v2, %v538_v45 }
 0x12f   : > { %v582_v50 = vadd.f32 %v581_v46, %v539_v47 }
 0x131   : > { %v603_v53 = vmax.f32 %v582_v50, 0.0 }
 0x134   : > { %v540_v48 = vpop.f32.mrf.mxu0 }
 0x135   : > { %v583_v49 = vpop.f32.mrf.mxu1  ;;  %v541_v51 = vadd.f32 %v1592_v2, %v540_v48 }
 0x137   : > { %v584_v52 = vadd.f32 %v583_v49, %v541_v51 }
 0x139   : > { %v604_v54 = vmax.f32 %v584_v52, 0.0 }
 0x13b   : > { %v612_v55 = vpack.c.bf16 %v604_v54, %v603_v53 }
 0x13c   : > { %v543_v56 = vpop.f32.mrf.mxu0 }
 0x13d   : > { %v586_v57 = vpop.f32.mrf.mxu1  ;;  %711 = vmatmul.bf16.gmra.mxu2 %v612_v55  ;;  %v544_v58 = vadd.f32 %v1592_v2, %v543_v56 }
 0x13f   : > { %v587_v61 = vadd.f32 %v586_v57, %v544_v58 }
 0x141   : > { %v605_v0 = vmax.f32 %v587_v61, 0.0 }
 0x144   : > { %v545_v59 = vpop.f32.mrf.mxu0 }
 0x145   : > { %v588_v60 = vpop.f32.mrf.mxu1  ;;  %v546_v62 = vadd.f32 %v1592_v2, %v545_v59 }
 0x147   : > { %v589_v63 = vadd.f32 %v588_v60, %v546_v62 }
 0x149   : > { %v606_v1 = vmax.f32 %v589_v63, 0.0  ;;  %v1199_v63 = vld [vmem:[%s1717_s6] ss:$0 sm:$0xff] }
 0x14b   : > { %v613_v3 = vpack.c.bf16 %v606_v1, %v605_v0 }
 0x14c   : > { %v548_v4 = vpop.f32.mrf.mxu0 }
 0x14d   : > { %v591_v5 = vpop.f32.mrf.mxu1  ;;  %716 = vmatmul.bf16.gmra.mxu2 %v613_v3  ;;  %v549_v6 = vadd.f32 %v1592_v2, %v548_v4  ;;  %v1133_v2 = vld [vmem:[%s1716_s5 + $0x8] sm:$0xff] }
 0x14e   : > { %810 = vmatpush.bf16.msra.mxu3 %v1133_v2 }
 0x14f   : > { %v592_v7 = vadd.f32 %v591_v5, %v549_v6 }
 0x151   : > { %v607_v10 = vmax.f32 %v592_v7, 0.0 }
 0x152   : > { %811 = vmatpush.bf16.msra.mxu3 %v1132_v14 }
 0x153   : > { %v614_v11 = vpack.c.bf16 %v607_v10, %v607_v10 }
 0x154   : > { %v550_v8 = vpop.f32.mrf.mxu0 }
 0x155   : > { %v593_v9 = vpop.f32.mrf.mxu1 }
 0x15d   : > { %721 = vmatmul.bf16.gmra.mxu2 %v614_v11 }
 0x180   : > { %v692_v15 = vpop.f32.mrf.mxu2 }
 0x181   : > { %v693_v17 = vadd.f32 %v1198_v16, %v692_v15 }
 0x183   : > { %v726_v20 = vmax.f32 %v693_v17, 0.0 }
 0x188   : > { %v694_v18 = vpop.f32.mrf.mxu2 }
 0x189   : > { %v695_v19 = vadd.f32 %v1198_v16, %v694_v18 }
 0x18b   : > { %v727_v21 = vmax.f32 %v695_v19, 0.0 }
 0x18d   : > { %v739_v22 = vpack.c.bf16 %v727_v21, %v726_v20 }
 0x18f   : > { %1091 = vmatmul.msk.bf16.vlgmr.msra.gmra.mxu3 %vm782_vm0, %v739_v22 }
 0x190   : > { %v697_v23 = vpop.f32.mrf.mxu2 }
 0x191   : > { %v698_v24 = vadd.f32 %v1198_v16, %v697_v23 }
 0x193   : > { %v728_v27 = vmax.f32 %v698_v24, 0.0 }
 0x198   : > { %v699_v25 = vpop.f32.mrf.mxu2 }
 0x199   : > { %v700_v26 = vadd.f32 %v1198_v16, %v699_v25 }
 0x19b   : > { %v729_v28 = vmax.f32 %v700_v26, 0.0 }
 0x19d   : > { %v740_v29 = vpack.c.bf16 %v729_v28, %v728_v27 }
 0x19f   : > { %1092 = vmatmul.msk.bf16.gmra.mxu3 %vm782_vm0, %v740_v29 }
 0x1a0   : > { %v702_v30 = vpop.f32.mrf.mxu2 }
 0x1a1   : > { %v703_v31 = vadd.f32 %v1198_v16, %v702_v30 }
 0x1a3   : > { %v730_v34 = vmax.f32 %v703_v31, 0.0 }
 0x1a8   : > { %v704_v32 = vpop.f32.mrf.mxu2 }
 0x1a9   : > { %v705_v33 = vadd.f32 %v1198_v16, %v704_v32 }
 0x1ab   : > { %v731_v35 = vmax.f32 %v705_v33, 0.0 }
 0x1ad   : > { %v741_v36 = vpack.c.bf16 %v731_v35, %v730_v34 }
 0x1af   : > { %1093 = vmatmul.msk.bf16.gmra.mxu3 %vm782_vm0, %v741_v36 }
 0x1b0   : > { %v707_v37 = vpop.f32.mrf.mxu2 }
 0x1b1   : > { %v708_v38 = vadd.f32 %v1198_v16, %v707_v37 }
 0x1b3   : > { %v732_v41 = vmax.f32 %v708_v38, 0.0 }
 0x1b8   : > { %v709_v39 = vpop.f32.mrf.mxu2 }
 0x1b9   : > { %v710_v40 = vadd.f32 %v1198_v16, %v709_v39 }
 0x1bb   : > { %v733_v42 = vmax.f32 %v710_v40, 0.0 }
 0x1bd   : > { %v742_v43 = vpack.c.bf16 %v733_v42, %v732_v41 }
 0x1bf   : > { %1094 = vmatmul.msk.bf16.gmra.mxu3 %vm782_vm0, %v742_v43 }
 0x1c0   : > { %v712_v44 = vpop.f32.mrf.mxu2 }
 0x1c1   : > { %v713_v45 = vadd.f32 %v1198_v16, %v712_v44 }
 0x1c3   : > { %v734_v48 = vmax.f32 %v713_v45, 0.0 }
 0x1c8   : > { %v714_v46 = vpop.f32.mrf.mxu2 }
 0x1c9   : > { %v715_v47 = vadd.f32 %v1198_v16, %v714_v46 }
 0x1cb   : > { %v735_v49 = vmax.f32 %v715_v47, 0.0 }
 0x1cd   : > { %v743_v50 = vpack.c.bf16 %v735_v49, %v734_v48 }
 0x1cf   : > { %1095 = vmatmul.msk.bf16.gmra.mxu3 %vm782_vm0, %v743_v50 }
 0x1d0   : > { %v717_v51 = vpop.f32.mrf.mxu2 }
 0x1d1   : > { %v718_v52 = vadd.f32 %v1198_v16, %v717_v51 }
 0x1d3   : > { %v736_v55 = vmax.f32 %v718_v52, 0.0 }
 0x1d8   : > { %v719_v53 = vpop.f32.mrf.mxu2 }
 0x1d9   : > { %v720_v54 = vadd.f32 %v1198_v16, %v719_v53 }
 0x1db   : > { %v737_v56 = vmax.f32 %v720_v54, 0.0 }
 0x1dd   : > { %v744_v57 = vpack.c.bf16 %v737_v56, %v736_v55 }
 0x1df   : > { %1096 = vmatmul.msk.bf16.gmra.mxu3 %vm782_vm0, %v744_v57 }
 0x1e0   : > { %v722_v58 = vpop.f32.mrf.mxu2 }
 0x1e1   : > { %v723_v59 = vadd.f32 %v1198_v16, %v722_v58 }
 0x1e3   : > { %v738_v60 = vmax.f32 %v723_v59, 0.0 }
 0x1e5   : > { %v745_v62 = vpack.c.bf16 %v738_v60, %v738_v60 }
 0x1e8   : > { %v724_v61 = vpop.f32.mrf.mxu2 }
 0x1ef   : > { %1097 = vmatmul.msk.bf16.gmra.mxu3 %vm782_vm0, %v745_v62 }
 0x212   : > { %v813_v0 = vpop.f32.mrf.mxu3 }
 0x213   : > { %v814_v1 = vadd.f32 %v1199_v63, %v813_v0 }
 0x215   : > { %847 = vst [vmem:[%s1633_s16] sm:$0xff] %v814_v1 }
 0x21a   : > { %v815_v3 = vpop.f32.mrf.mxu3 }
 0x21b   : > { %v816_v4 = vadd.f32 %v1199_v63, %v815_v3 }
 0x21d   : > { %848 = vst [vmem:[%s1633_s16 + $0x8] sm:$0xff] %v816_v4 }
 0x222   : > { %v818_v5 = vpop.f32.mrf.mxu3 }
 0x223   : > { %v819_v6 = vadd.f32 %v1199_v63, %v818_v5 }
 0x225   : > { %849 = vst [vmem:[%s1633_s16 + $0x10] sm:$0xff] %v819_v6 }
 0x22a   : > { %v820_v7 = vpop.f32.mrf.mxu3 }
 0x22b   : > { %v821_v8 = vadd.f32 %v1199_v63, %v820_v7 }
 0x22d   : > { %850 = vst [vmem:[%s1633_s16 + $0x18] sm:$0xff] %v821_v8 }
 0x232   : > { %v823_v9 = vpop.f32.mrf.mxu3 }
 0x233   : > { %v824_v10 = vadd.f32 %v1199_v63, %v823_v9 }
 0x235   : > { %851 = vst [vmem:[%s1633_s16 + $0x20] sm:$0xff] %v824_v10 }
 0x23a   : > { %v825_v11 = vpop.f32.mrf.mxu3 }
 0x23b   : > { %v826_v12 = vadd.f32 %v1199_v63, %v825_v11 }
 0x23d   : > { %852 = vst [vmem:[%s1633_s16 + $0x28] sm:$0xff] %v826_v12 }
 0x242   : > { %v828_v13 = vpop.f32.mrf.mxu3 }
 0x243   : > { %v829_v2 = vadd.f32 %v1199_v63, %v828_v13 }
 0x245   : > { %853 = vst [vmem:[%s1633_s16 + $0x30] sm:$0xff] %v829_v2 }
 0x24a   : > { %v830_v14 = vpop.f32.mrf.mxu3 }
 0x24b   : > { %v831_v15 = vadd.f32 %v1199_v63, %v830_v14 }
 0x24d   : > { %854 = vst [vmem:[%s1633_s16 + $0x38] sm:$0xff] %v831_v15 }
 0x252   : > { %v833_v16 = vpop.f32.mrf.mxu3 }
 0x253   : > { %v834_v17 = vadd.f32 %v1199_v63, %v833_v16 }
 0x255   : > { %855 = vst [vmem:[%s1633_s16 + $0x40] sm:$0xff] %v834_v17 }
 0x25a   : > { %v835_v18 = vpop.f32.mrf.mxu3 }
 0x25b   : > { %v836_v19 = vadd.f32 %v1199_v63, %v835_v18 }
 0x25d   : > { %856 = vst [vmem:[%s1633_s16 + $0x48] sm:$0xff] %v836_v19 }
 0x262   : > { %v838_v20 = vpop.f32.mrf.mxu3 }
 0x263   : > { %v839_v21 = vadd.f32 %v1199_v63, %v838_v20 }
 0x265   : > { %857 = vst [vmem:[%s1633_s16 + $0x50] sm:$0xff] %v839_v21 }
 0x26a   : > { %v840_v22 = vpop.f32.mrf.mxu3 }
 0x26b   : > { %v841_v23 = vadd.f32 %v1199_v63, %v840_v22 }
 0x26d   : > { %858 = vst [vmem:[%s1633_s16 + $0x58] sm:$0xff] %v841_v23 }
 0x272   : > { %v843_v24 = vpop.f32.mrf.mxu3 }
 0x273   : > { %v844_v25 = vadd.f32 %v1199_v63, %v843_v24 }
 0x275   : > { %859 = vst [vmem:[%s1633_s16 + $0x60] sm:$0xff] %v844_v25 }
 0x276   : > { %867 = sbr.rel (!%p1453_p11) target bundleno = 666 (0x29a), region = 60 }
 0x27a   : > { %v845_v26 = vpop.f32.mrf.mxu3 }
 0x27b   : > { %s1748_s12 = smov (!%p870_p6, %s869_s12), 13 }
 0x27c   : > { %s1098_s15 = sshll.u32 %s1748_s12, 3 }
 0x27d   : > { %s873_s9 = ssub.s32 104, %s1098_s15 }
 0x27e   : > { %s874_s19 = sshll.u32 %s873_s9, 4 }
 0x27f   : > { %875 = vsyncadd %s861_s1, %s874_s19  ;;  %p1657_p13 = scmp.ne.s32.totalorder %s1098_s15, 0  ;;  %s1136_s11 = smul.u32 104, %s1422_s28 }
 0x280   : > { %s880_s22 = sshll.u32 %s1633_s16, 4  ;;  %s1102_s29 = sshll.u32 %s1748_s12, 7  ;;  %s1667_s22 = int_to_ptr.vmem [resolvable:$true] %s880_s22 }
 0x281   : > { %s878_s23 = scalar_lea.hbm %s1718_s7, %s1136_s11  ;;  %s1269_s20 = sshra.s32 %s1667_s22, 4  ;;  %s1270_s20 = int_to_ptr.vmem [resolvable:$true] %s1269_s20 }
 0x282   : > { %s882_s26 = sshll.u32 %s878_s23, 4  ;;  %s1271_s18 = sshrl.u32 %s1102_s29, 4  ;;  %s1669_s26 = int_to_ptr.hbm [resolvable:$true] %s882_s26 }
 0x283   : > { %s1276_s30 = scalar_lea.vmem %s1270_s20, %s1271_s18  ;;  %s1358_s28 = smov [#allocation7]  }
 0x284   : > { %p1277_p11 = scmp.ne.s32.totalorder %s1270_s20, %s1276_s30  ;;  %s1280_s16 = scalar_lea.vmem %s1358_s28, 208 }
 0x285   : > { %p1282_p9 = scmp.lt.s32.totalorder %s1280_s16, %s1276_s30 }
 0x286   : > { %p1278_p2 = pnand %p1277_p11, %p1657_p13 }
 0x288   : > { %p1279_p5 = pneg %p1278_p2 }
 0x28a   : > { %p1284_p10 = pnand %p1282_p9, %p1279_p5 }
 0x28c   : > { %1287 = shalt.err (!%p1284_p10)
}
 0x28d   : > { %s1288_s21 = sshra.s32 %s1669_s26, 4  ;;  %s1299_s11 = scalar_lea.hbm %s1718_s7, 200  ;;  %s1289_s21 = int_to_ptr.hbm [resolvable:$true] %s1288_s21 }
 0x28e   : > { %s1295_s15 = scalar_lea.hbm %s1289_s21, %s1271_s18  ;;  %p1300_p7 = scmp.lt.s32.totalorder %s1289_s21, %s1718_s7 }
 0x28f   : > { %p1296_p1 = scmp.ne.s32.totalorder %s1289_s21, %s1295_s15  ;;  %p1301_p8 = scmp.lt.s32.totalorder %s1299_s11, %s1295_s15 }
 0x291   : > { %p1297_p0 = pnand %p1296_p1, %p1657_p13  ;;  %p1302_p4 = por %p1301_p8, %p1300_p7 }
 0x293   : > { %p1298_p3 = pneg %p1297_p0 }
 0x295   : > { %p1303_p12 = pnand %p1302_p4, %p1298_p3 }
 0x297   : > { %1306 = shalt.err (!%p1303_p12)
}
 0x298   : > { %s1359_s23 = smov 128   ;;  %s1360_s20 = smov 8  }
 0x299   : > { %888 = dma.vmem_to_hbm [thread:$0]  (%p1657_p13), %s1667_s22, %s1102_s29, %s1669_s26, %s861_s1, %s1359_s23, %s1359_s23, %s1360_s20  }
 0x29a PF: > { %s897_s18 = sand.u32 1, %s1338_s24   ;;  %p1738_p6 = scmp.ne.s32.totalorder %s1731_s14, 0 }
 0x29b   : > { %p1739_p11 = scmp.ge.s32.totalorder %s1350_s27, 2  ;;  %s898_s30 = scalar_lea.sflag [#allocation4], %s897_s18 }
 0x29d   : > { %p1152_p2 = pnand %p1739_p11, %p1738_p6 }
 0x29f   : > { %p1153_p5 = pneg %p1152_p2 }
 0x2a1   : > { %1333 = dma.done.wait (%p1153_p5), %s898_s30, 1664  }
 0x2a2   : > { %1335 = vsyncadd (%p1153_p5), %s898_s30, 4294965632  ;;  %s1740_s27 = sld [smem:[#allocation12_spill]]  ;;  %s1743_s24 = smov %s1342_s25 }
 0x2a3   : > { %s1741_s28 = sld [smem:[#allocation11_spill]] }
 0x2a4   : > { %s1742_s26 = sld [smem:[#allocation13_spill]] }
 0x2a8   : > { %p21_p9 = scmp.ge.s32.totalorder %s1740_s27, 4  }
 0x2a9   : > { %s1744_s25 = smov %s1741_s28 }
 0x2aa   :  { %23 = sbr.rel (!%p21_p9) target bundleno = 8 (0x8), region = 97 }
 0x2af   :  { %904 = vsyncpa [#allocation3], 1 }
 0x2b0   :  { %906 = vsyncpa [#allocation3 + $0x1], 1 }
 0x2b1   :  { %907 = vsyncpa [#allocation6], 1 }
 0x2b2   :  { %908 = vsyncpa [#allocation4], 1 }
 0x2b3   :  { %910 = vsyncpa [#allocation4 + $0x1], 1 }

</bundles_post_ra>
